<compile_context>
chip_gen: v5e
topology: v5e:2x2
jax: 0.10.0
libtpu: 0.0.40
codegen_flags: <defaults>
</compile_context>

<pallas_src>
import functools

import jax
import jax.numpy as jnp
from jax.experimental import pallas as pl
from jax.experimental.pallas import tpu as pltpu

_MIB = 1024 * 1024


def _layernorm2d_kernel(x_ref, w_ref, b_ref, o_ref, *, eps):
    # x_ref: (1, C, T) -- one batch element, full channel extent, spatial tile.
    # w_ref / b_ref: (1, C, 1) -- resident affine params.
    x = x_ref[...].astype(jnp.float32)
    mu = jnp.mean(x, axis=1, keepdims=True)           # cross-sublane reduce (XLU)
    xc = x - mu
    var = jnp.mean(xc * xc, axis=1, keepdims=True)    # biased variance (matches torch ref)
    inv = jax.lax.rsqrt(var + eps)                    # EUP, effectively free
    w = w_ref[...].astype(jnp.float32)
    b = b_ref[...].astype(jnp.float32)
    o_ref[...] = (w * (xc * inv) + b).astype(o_ref.dtype)


def _vmem_capacity_bytes():
    """Per-core VMEM capacity; conservative (v7x, 64 MiB) fallback if unknown."""
    try:
        info = pltpu.get_tpu_info()
        cap = getattr(info, "vmem_capacity_bytes", None)
        if cap:
            return int(cap)
    except Exception:
        pass
    return 64 * _MIB


def _choose_spatial_tile(C, HW, itemsize, n_batch, vmem_budget_bytes,
                         knee_bytes=4 * _MIB):
    """Pick lane tile t and spatial grid step count.

    Boundary blocks are clipped by the DMA engine, so HBM traffic does not
    depend on the tile size; maximize the tile within the VMEM budget to
    minimize per-grid-step overhead, preferring a tile that divides the
    spatial extent exactly (all stores unmasked, lane-dense).

    Returns (t, steps, est_vmem_bytes).
    """
    nb = -(-HW // 128)                       # number of 128-lane groups
    group_in_bytes = C * 128 * itemsize
    # Per lane-group VMEM estimate: x + out double-buffered (4x, input dtype)
    # plus ~3 full-tile f32 temporaries inside the kernel body.
    vmem_per_group = 4 * group_in_bytes + 3 * C * 128 * 4

    gmax = max(1, vmem_budget_bytes // vmem_per_group)
    gmax = min(gmax, nb)

    # With a single batch element, split the spatial axis so both v7x
    # TensorCores get work -- but only if each half still amortizes the
    # ~0.35 us per-step overhead.
    if n_batch == 1 and nb >= 2:
        half_groups = -(-nb // 2)
        if half_groups * group_in_bytes >= knee_bytes:
            gmax = min(gmax, half_groups)

    if gmax >= nb:
        # Whole spatial extent as one block.  Using the full array dim as the
        # lane block size is always legal (even when HW % 128 != 0) and keeps
        # every access unmasked without any wrapper-side padding.
        return HW, 1, vmem_per_group * nb

    steps = -(-nb // gmax)                   # fewest steps reachable in budget
    g = -(-nb // steps)                      # smallest (balanced) g at that count
    # Prefer an exact tiling of nb at the same step count: when HW % 128 == 0
    # this keeps every store an unmasked lane-dense vst.
    for cand in range(g, gmax + 1):
        if -(-nb // cand) != steps:
            break
        if nb % cand == 0:
            g = cand
            break
    return 128 * g, steps, vmem_per_group * g


def layernorm2d(x, weight, bias, eps=1e-6, *, vmem_budget_bytes=None):
    """x: (N, C, H, W); weight, bias: (C,). Returns (N, C, H, W)."""
    N, C, H, W = x.shape
    HW = H * W
    x_flat = x.reshape(N, C, HW)
    itemsize = jnp.dtype(x.dtype).itemsize

    vmem_cap = _vmem_capacity_bytes()
    if vmem_budget_bytes is None:
        # ~44 MiB budget on v7x (64 MiB physical), capped at 64 MiB on
        # v5e/v6e (128 MiB physical) -- generous headroom for Mosaic scratch.
        vmem_budget_bytes = min(64 * _MIB, max(8 * _MIB, vmem_cap - 20 * _MIB))

    t, steps, est_vmem = _choose_spatial_tile(C, HW, itemsize, N, vmem_budget_bytes)

    # Derived scoped-VMEM limit: pipeline buffers + f32 temps + slack; must
    # clear v5e's 16 MiB default scoped limit and stay inside physical VMEM.
    vmem_limit = int(min(vmem_cap, max(32 * _MIB, est_vmem + 8 * _MIB)))

    w = weight.reshape(1, C, 1)
    b = bias.reshape(1, C, 1)

    out = pl.pallas_call(
        functools.partial(_layernorm2d_kernel, eps=eps),
        out_shape=jax.ShapeDtypeStruct((N, C, HW), x.dtype),
        grid_spec=pltpu.PrefetchScalarGridSpec(
            num_scalar_prefetch=0,
            # N outer, spatial inner: consecutive steps read contiguous HBM
            # within one batch element.
            grid=(N, steps),
            in_specs=[
                pl.BlockSpec((1, C, t), lambda n, j: (n, 0, j)),
                pl.BlockSpec((1, C, 1), lambda n, j: (0, 0, 0)),
                pl.BlockSpec((1, C, 1), lambda n, j: (0, 0, 0)),
            ],
            out_specs=pl.BlockSpec((1, C, t), lambda n, j: (n, 0, j)),
        ),
        compiler_params=pltpu.CompilerParams(
            dimension_semantics=("parallel", "parallel"),
            vmem_limit_bytes=vmem_limit,
        ),
        # TODO(synk): if an xprof trace on v5e shows exposed DMA at tile
        # boundaries, sweep pipeline_mode=pl.Buffered(3) on the x in_spec.
    )(x_flat, w, b)

    return out.reshape(N, C, H, W)


def layernorm2d_ref(x, weight, bias, eps=1e-6):
    mu = jnp.mean(x, axis=1, keepdims=True)
    var = jnp.mean((x - mu) ** 2, axis=1, keepdims=True)
    y = (x - mu) / jnp.sqrt(var + eps)
    return weight.reshape(1, -1, 1, 1) * y + bias.reshape(1, -1, 1, 1)


def _check(N, C, H, W, key, eps=1e-6, vmem_budget_bytes=None):
    kx, kw, kb = jax.random.split(key, 3)
    x = jax.random.normal(kx, (N, C, H, W), dtype=jnp.float32)
    # Module __init__ uses ones/zeros; perturb so the affine path is exercised.
    weight = jnp.ones((C,), jnp.float32) + 0.1 * jax.random.normal(kw, (C,), jnp.float32)
    bias = jnp.zeros((C,), jnp.float32) + 0.1 * jax.random.normal(kb, (C,), jnp.float32)

    out = layernorm2d(x, weight, bias, eps=eps, vmem_budget_bytes=vmem_budget_bytes)
    out = jax.block_until_ready(out)

    ref = layernorm2d_ref(x, weight, bias, eps=eps)
    assert out.shape == (N, C, H, W)
    assert jnp.allclose(out, ref, atol=1e-5, rtol=1e-5), \
        f"mismatch vs reference at shape {(N, C, H, W)}"


if __name__ == "__main__":
    key = jax.random.PRNGKey(0)
    k1, k2, k3 = jax.random.split(key, 3)

    # Primary small test (HW multiple of 128; single full-extent spatial block).
    _check(2, 4, 16, 16, k1)

    # Ragged HW (120), N == 1: full-array-dim lane block, no pad/slice needed.
    _check(1, 8, 10, 12, k2)

    # Multi-step path with a clipped/masked final boundary block: a tiny VMEM
    # budget forces 128-lane tiles over HW = 400 (3 full blocks + 16-lane tail).
    _check(1, 8, 20, 20, k3, vmem_budget_bytes=30000)

    print("KERNEL_OK")
</pallas_src>

<mosaic_0001>
module attributes {stable_mosaic.version = 11 : i64} {
  func.func @_layernorm2d_kernel(%arg0: i32, %arg1: i32, %arg2: memref<1x4x256xf32, #tpu.memory_space<vmem>>, %arg3: memref<1x4x1xf32, #tpu.memory_space<vmem>>, %arg4: memref<1x4x1xf32, #tpu.memory_space<vmem>>, %arg5: memref<1x4x256xf32, #tpu.memory_space<vmem>>) attributes {dimension_semantics = [#tpu.dimension_semantics<parallel>, #tpu.dimension_semantics<parallel>], iteration_bounds = array<i64: 2, 1>, scalar_prefetch = 0 : i64, scratch_operands = 0 : i64, tpu.core_type = #tpu.core_type<tc>, window_params = [{transform_indices = @transform_0, window_bounds = array<i64: 1, 4, 256>}, {pipeline_mode = #tpu.pipeline_mode<synchronous>, transform_indices = @transform_1, window_bounds = array<i64: 1, 4, 1>}, {pipeline_mode = #tpu.pipeline_mode<synchronous>, transform_indices = @transform_2, window_bounds = array<i64: 1, 4, 1>}, {transform_indices = @transform_3, window_bounds = array<i64: 1, 4, 256>}]} {
    %c0 = arith.constant 0 : index
    %c0_0 = arith.constant 0 : index
    %c0_1 = arith.constant 0 : index
    %0 = vector.load %arg2[%c0, %c0_0, %c0_1] : memref<1x4x256xf32, #tpu.memory_space<vmem>>, vector<1x4x256xf32>
    %cst = arith.constant dense<0.000000e+00> : vector<1x256xf32>
    %1 = vector.multi_reduction <add>, %0, %cst [1] : vector<1x4x256xf32> to vector<1x256xf32>
    %2 = vector.shape_cast %1 : vector<1x256xf32> to vector<1x1x256xf32>
    %cst_2 = arith.constant 4.000000e+00 : f32
    %3 = vector.broadcast %cst_2 : f32 to vector<1x1x256xf32>
    %4 = arith.divf %2, %3 : vector<1x1x256xf32>
    %5 = vector.broadcast %4 : vector<1x1x256xf32> to vector<1x4x256xf32>
    %6 = arith.subf %0, %5 : vector<1x4x256xf32>
    %7 = arith.mulf %6, %6 : vector<1x4x256xf32>
    %cst_3 = arith.constant dense<0.000000e+00> : vector<1x256xf32>
    %8 = vector.multi_reduction <add>, %7, %cst_3 [1] : vector<1x4x256xf32> to vector<1x256xf32>
    %9 = vector.shape_cast %8 : vector<1x256xf32> to vector<1x1x256xf32>
    %cst_4 = arith.constant 4.000000e+00 : f32
    %10 = vector.broadcast %cst_4 : f32 to vector<1x1x256xf32>
    %11 = arith.divf %9, %10 : vector<1x1x256xf32>
    %cst_5 = arith.constant 9.99999997E-7 : f32
    %12 = vector.broadcast %cst_5 : f32 to vector<1x1x256xf32>
    %13 = arith.addf %11, %12 : vector<1x1x256xf32>
    %14 = math.rsqrt %13 : vector<1x1x256xf32>
    %c0_6 = arith.constant 0 : index
    %c0_7 = arith.constant 0 : index
    %c0_8 = arith.constant 0 : index
    %15 = vector.load %arg3[%c0_6, %c0_7, %c0_8] : memref<1x4x1xf32, #tpu.memory_space<vmem>>, vector<1x4x1xf32>
    %c0_9 = arith.constant 0 : index
    %c0_10 = arith.constant 0 : index
    %c0_11 = arith.constant 0 : index
    %16 = vector.load %arg4[%c0_9, %c0_10, %c0_11] : memref<1x4x1xf32, #tpu.memory_space<vmem>>, vector<1x4x1xf32>
    %17 = vector.broadcast %14 : vector<1x1x256xf32> to vector<1x4x256xf32>
    %18 = arith.mulf %6, %17 : vector<1x4x256xf32>
    %19 = vector.broadcast %15 : vector<1x4x1xf32> to vector<1x4x256xf32>
    %20 = arith.mulf %19, %18 : vector<1x4x256xf32>
    %21 = vector.broadcast %16 : vector<1x4x1xf32> to vector<1x4x256xf32>
    %22 = arith.addf %20, %21 : vector<1x4x256xf32>
    %c0_12 = arith.constant 0 : index
    %c0_13 = arith.constant 0 : index
    %c0_14 = arith.constant 0 : index
    %23 = vector.load %arg5[%c0_12, %c0_13, %c0_14] : memref<1x4x256xf32, #tpu.memory_space<vmem>>, vector<1x4x256xf32>
    tpu.vector_store %arg5[%c0_12, %c0_13, %c0_14], %22 {strides = array<i32>} : memref<1x4x256xf32, #tpu.memory_space<vmem>>, vector<1x4x256xf32>,
    return
  }
  func.func @transform_0(%arg0: i32, %arg1: i32) -> (i32, i32, i32) {
    %c0_i32 = arith.constant 0 : i32
    %c0_i32_0 = arith.constant 0 : i32
    return %arg0, %c0_i32, %arg1 : i32, i32, i32
  }
  func.func @transform_1(%arg0: i32, %arg1: i32) -> (i32, i32, i32) {
    %c0_i32 = arith.constant 0 : i32
    %c0_i32_0 = arith.constant 0 : i32
    %c0_i32_1 = arith.constant 0 : i32
    %c0_i32_2 = arith.constant 0 : i32
    return %c0_i32, %c0_i32_0, %c0_i32_1 : i32, i32, i32
  }
  func.func @transform_2(%arg0: i32, %arg1: i32) -> (i32, i32, i32) {
    %c0_i32 = arith.constant 0 : i32
    %c0_i32_0 = arith.constant 0 : i32
    %c0_i32_1 = arith.constant 0 : i32
    %c0_i32_2 = arith.constant 0 : i32
    return %c0_i32, %c0_i32_0, %c0_i32_1 : i32, i32, i32
  }
  func.func @transform_3(%arg0: i32, %arg1: i32) -> (i32, i32, i32) {
    %c0_i32 = arith.constant 0 : i32
    %c0_i32_0 = arith.constant 0 : i32
    return %arg0, %c0_i32, %arg1 : i32, i32, i32
  }
}

</mosaic_0001>

<bundles_post_ra>
// kernel: tpu_custom_call.1
= control target key start
LH: loop header
LB: loop body
LE: loop exit
PB: predicated region body
PF: predicated region fallthrough
CT: control target
= control target key end

     0   :  { %8 = vsyncpa [#allocation3], 0  ;;  %s789_s0 = inlined_call_operand.hbm [shape: f32[2,4,256], index: 0, kind: input, shape index: {}]   ;;  %s790_s1 = inlined_call_operand.vmem [shape: f32[1,4,1], index: 1, kind: input, shape index: {}]   ;;  %s791_s2 = inlined_call_operand.vmem [shape: f32[1,4,1], index: 2, kind: input, shape index: {}]   ;;  %s792_s3 = inlined_call_operand.hbm [shape: f32[2,4,256], index: 3, kind: output, shape index: {}]  }
   0x1   :  { %10 = vsyncpa [#allocation3 + $0x1], 0 }
   0x2   :  { %11 = vsyncpa [#allocation4], 0 }
   0x3   :  { %13 = vsyncpa [#allocation4 + $0x1], 0  ;;  %s652_s12 = smov 0   ;;  %s654_s13 = smov 0  }
   0x4   :  { %s656_s14 = smov 0   ;;  %s658_s15 = smov 0  }
   0x5   :  { %s660_s16 = smov 0   ;;  %s662_s17 = smov 0  }
   0x6 LB: > { %s428_s18 = sadd.s32 4294967295, %s628_s17   ;;  %s429_s19 = sadd.s32 4294967294, %s628_s17   ;;  %s628_s17 = sphi %s662_s17, %s19_s17   ;;  %s624_s16 = sphi %s660_s16, %s801_s16   ;;  %s620_s15 = sphi %s658_s15, %s800_s15   ;;  %s616_s14 = sphi %s656_s14, %s799_s14   ;;  %s612_s13 = sphi %s654_s13, %s798_s13   ;;  %s608_s12 = sphi %s652_s12, %s797_s12  }
   0x7   : > { %s31_s20 = sadd.s32 1, %s624_s16  ;;  %s40_s21 = sadd.s32 1, %s616_s14 }
   0x8   : > { %p33_p0 = scmp.ge.s32.totalorder %s31_s20, 2  ;;  %p47_p1 = scmp.ne.s32.totalorder %s616_s14, %s612_s13 }
   0x9   : > { %p48_p2 = scmp.eq.s32.totalorder %s628_s17, 0  ;;  %p53_p3 = scmp.ne.s32.totalorder %s612_s13, %s608_s12 }
   0xa   : > { %s803_s20 = smov (%p33_p0, %s31_s20), 0  ;;  %p54_p5 = scmp.eq.s32.totalorder %s428_s18, 0 }
   0xb   : > { %p693_p4 = por %p48_p2, %p47_p1  ;;  %s35_s23 = ssub.s32 %s624_s16, %s803_s20 }
   0xc   : > { %p121_p6 = scmp.eq.s32.totalorder %s428_s18, 1  ;;  %p38_p7 = scmp.eq.s32.totalorder %s35_s23, 0 }
   0xd   : > { %p699_p8 = por %p54_p5, %p53_p3  ;;  %p127_p10 = scmp.eq.s32.totalorder %s429_s19, 1 }
   0xe   : > { %p703_p9 = por %p121_p6, %p47_p1  ;;  %p431_p12 = scmp.ge.s32.totalorder %s628_s17, 2 }
   0xf   : > { %s708_s26 = scalar_select %p38_p7, %s616_s14, %s40_s21  }
  0x10   : > { %p710_p11 = por %p127_p10, %p53_p3  ;;  %p457_p13 = scmp.lt.s32.totalorder %s628_s17, 2 }
  0x11   : > { %s153_s28 = sand.u32 1, %s616_s14   ;;  %s443_s30 = sshll.u32 %s624_s16, 3 }
  0x12   : > { %s432_s29 = sshll.u32 %s153_s28, 3  ;;  %s164_s6 = scalar_lea.hbm %s789_s0, %s443_s30 }
  0x13   : > { %s157_s7 = scalar_lea.vmem [#allocation2], %s432_s29  ;;  %s166_s9 = sshll.u32 %s164_s6, 4  ;;  %s167_s9 = int_to_ptr.hbm [resolvable:$true] %s166_s9 }
  0x14   : > { %s168_s8 = sshll.u32 %s157_s7, 4  ;;  %p450_p0 = pnand %p457_p13, %p693_p4  ;;  %s169_s8 = int_to_ptr.vmem [resolvable:$true] %s168_s8 }
  0x15   : > { %p435_p1 = scmp.ge.s32.totalorder %s628_s17, 1  ;;  %p173_p2 = scmp.lt.s32.totalorder %s628_s17, 3 }
  0x16   : > { %s154_s10 = scalar_lea.sflag [#allocation3], %s153_s28 }
  0x17   : > { %452 = dma.hbm_to_vmem [thread:$0]  (!%p450_p0), %s167_s9, 128, %s169_s8, %s154_s10  }
  0x18   : > { %p174_p3 = pnand %p435_p1, %p173_p2 }
  0x19   : > { %s726_s11 = sand.u32 (!%p174_p3), 1, %s612_s13  }
  0x1a   : > { %177 = sbr.rel (%p174_p3) target bundleno = 165 (0xa5), region = 32  ;;  %s436_s18 = sshll.u32 (!%p174_p3), %s726_s11, 3 }
  0x1b   : > { %s180_s19 = scalar_lea.sflag (!%p174_p3), [#allocation3], %s726_s11  ;;  %s183_s21 = scalar_lea.vmem (!%p174_p3), [#allocation2], %s436_s18 }
  0x1f   : > { %599 = dma.done.wait (%p699_p8), %s180_s19, 128  }
  0x20   : > { %601 = vsyncadd (%p699_p8), %s180_s19, 4294967168  ;;  %v630_v0 = vmov 0   ;;  %v631_v1 = vmov 4.0   ;;  %v209_v3 = vld [vmem:[%s183_s21] sm:$0xff]  ;;  %v291_v4 = vld [vmem:[%s790_s1] sm:$0xf] }
  0x21   : > { %509 = vset.pattern.permute.xlu0 %v630_v0  ;;  %510 = vrcp.f32 %v631_v1  ;;  %211 = vst [vmem:[#allocation1] ss:$2 sm:$0xff] %v209_v3  ;;  %v292_v6 = vld [vmem:[%s791_s2] sm:$0xf]  ;;  %vm216_vm0 = vcmask 1043456   ;;  %s444_s24 = sshll.u32 %s620_s15, 3 }
  0x22   : > { %301 = vperm.xlu0 %509, %v291_v4   ;;  %s339_s5 = scalar_lea.hbm %s792_s3, %s444_s24  ;;  %s206_s6 = scalar_lea.vmem [#allocation5], %s436_s18 }
  0x23   : > { %s341_s7 = sshll.u32 %s206_s6, 4  ;;  %s343_s8 = sshll.u32 %s339_s5, 4  ;;  %s342_s7 = int_to_ptr.vmem [resolvable:$true] %s341_s7  ;;  %s344_s8 = int_to_ptr.hbm [resolvable:$true] %s343_s8 }
  0x24   : > { %s326_s15 = scalar_lea.sflag [#allocation4], %s726_s11  ;;  %s560_s9 = sshra.s32 %s344_s8, 4  ;;  %s561_s9 = int_to_ptr.hbm [resolvable:$true] %s560_s9 }
  0x25   : > { %s562_s10 = scalar_lea.hbm %s561_s9, 8  ;;  %s566_s18 = scalar_lea.hbm %s792_s3, 16 }
  0x26   : > { %p563_p4 = scmp.ne.s32.totalorder %s561_s9, %s562_s10  ;;  %p567_p7 = scmp.lt.s32.totalorder %s561_s9, %s792_s3 }
  0x27   : > { %v511_v2 = vpop.eup %510  ;;  %p568_p8 = scmp.lt.s32.totalorder %s566_s18, %s562_s10 }
  0x28   : > { %v232_v5 = vmul.f32 4.0, %v511_v2  ;;  %v212_v8 = vld.sshfl [vmem:[#allocation1] sm:$0xff pattern:$0x75316420]  ;;  %vm236_vm1 = vweird.f32 %v511_v2  ;;  %p564_p5 = pnand %p563_p4, %p703_p9 }
  0x29   : > { %v213_v9 = vld.sshfl [vmem:[#allocation1 + $0x8] sm:$0xff pattern:$0x75316420]  ;;  %v217_v10 = vsel %vm216_vm0, %v212_v8, 0.0  ;;  %p569_p10 = por %p568_p8, %p567_p7 }
  0x2a   : > { %v233_v7 = vsub.f32 1.0, %v232_v5  ;;  %314 = vperm.xlu0 %509, %v292_v6   ;;  %v224_v11 = vsel %vm216_vm0, %v213_v9, 0.0  ;;  %v218_v12 = vrot.slane %v217_v10, 4  ;;  %p565_p6 = pneg %p564_p5 }
  0x2b   : > { %v225_v13 = vrot.slane %v224_v11, 4 }
  0x2c   : > { %v234_v14 = vmul.f32 %v511_v2, %v233_v7  ;;  %v219_v15 = vadd.f32 %v218_v12, %v217_v10  ;;  %p570_p13 = pnand %p569_p10, %p565_p6 }
  0x2d   : > { %v226_v16 = vadd.f32 %v225_v13, %v224_v11 }
  0x2e   : > { %v220_v17 = vrot.slane %v219_v15, 2  ;;  %v235_v19 = vadd.f32 %v511_v2, %v234_v14 }
  0x2f   : > { %v227_v18 = vrot.slane %v226_v16, 2 }
  0x30   : > { %v221_v20 = vadd.f32 %v220_v17, %v219_v15  ;;  %v237_v24 = vsel %vm236_vm1, %v511_v2, %v235_v19 }
  0x31   : > { %v228_v21 = vadd.f32 %v227_v18, %v226_v16 }
  0x32   : > { %v222_v22 = vrot.slane %v221_v20, 1 }
  0x33   : > { %v229_v23 = vrot.slane %v228_v21, 1 }
  0x34   : > { %v223_v25 = vadd.f32 %v222_v22, %v221_v20 }
  0x35   : > { %v230_v26 = vadd.f32 %v229_v23, %v228_v21 }
  0x36   : > { %v238_v27 = vmul.f32 %v237_v24, %v223_v25 }
  0x37   : > { %v239_v28 = vmul.f32 %v237_v24, %v230_v26 }
  0x39   : > { %v242_v29 = vrot.slane %v239_v28, 4 }
  0x3b   : > { %v243_v30 = vsel %vm216_vm0, %v238_v27, %v242_v29 }
  0x3c   : > { %v245_v31 = vsub.f32 %v209_v3, %v243_v30 }
  0x3e   : > { %v246_v32 = vmul.f32 %v245_v31, %v245_v31 }
  0x40   : > { %248 = vst [vmem:[#allocation1] ss:$2 sm:$0xff] %v246_v32 }
  0x47   : > { %v249_v33 = vld.sshfl [vmem:[#allocation1] sm:$0xff pattern:$0x75316420]  ;;  %v250_v34 = vld.sshfl [vmem:[#allocation1 + $0x8] sm:$0xff pattern:$0x75316420] }
  0x48   : > { %v253_v35 = vsel %vm216_vm0, %v249_v33, 0.0  ;;  %v260_v36 = vsel %vm216_vm0, %v250_v34, 0.0 }
  0x49   : > { %v254_v37 = vrot.slane %v253_v35, 4  ;;  %v261_v38 = vrot.slane %v260_v36, 4 }
  0x4b   : > { %v255_v39 = vadd.f32 %v254_v37, %v253_v35  ;;  %v262_v40 = vadd.f32 %v261_v38, %v260_v36 }
  0x4d   : > { %v256_v41 = vrot.slane %v255_v39, 2  ;;  %v263_v42 = vrot.slane %v262_v40, 2 }
  0x4f   : > { %v257_v43 = vadd.f32 %v256_v41, %v255_v39  ;;  %v264_v44 = vadd.f32 %v263_v42, %v262_v40 }
  0x51   : > { %v258_v45 = vrot.slane %v257_v43, 1  ;;  %v265_v46 = vrot.slane %v264_v44, 1 }
  0x53   : > { %v259_v47 = vadd.f32 %v258_v45, %v257_v43  ;;  %v266_v48 = vadd.f32 %v265_v46, %v264_v44 }
  0x55   : > { %v267_v49 = vmul.f32 %v259_v47, %v237_v24  ;;  %v268_v50 = vmul.f32 %v266_v48, %v237_v24 }
  0x57   : > { %v269_v51 = vadd.f32 1e-06, %v267_v49  ;;  %v270_v52 = vadd.f32 1e-06, %v268_v50 }
  0x59   : > { %512 = vrsqrt.f32 %v269_v51  ;;  %vm287_vm2 = vweird.f32 %v270_v52  ;;  %vm277_vm4 = vweird.f32 %v269_v51 }
  0x5a   : > { %514 = vrsqrt.f32 %v270_v52 }
  0x5f   : > { %v513_v53 = vpop.eup %512 }
  0x60   : > { %v515_v54 = vpop.eup %514  ;;  %v272_v55 = vmul.f32 %v513_v53, %v269_v51  ;;  %vm278_vm5 = vweird.f32 %v513_v53 }
  0x61   : > { %v282_v56 = vmul.f32 %v515_v54, %v270_v52  ;;  %vm288_vm3 = vweird.f32 %v515_v54  ;;  %vm279_vm7 = vmor %vm277_vm4, %vm278_vm5 }
  0x62   : > { %v273_v57 = vmul.f32 %v513_v53, %v272_v55  ;;  %vm289_vm6 = vmor %vm287_vm2, %vm288_vm3 }
  0x63   : > { %v283_v58 = vmul.f32 %v515_v54, %v282_v56 }
  0x64   : > { %v274_v59 = vmul.f32 0.5, %v273_v57 }
  0x65   : > { %v284_v60 = vmul.f32 0.5, %v283_v58 }
  0x66   : > { %v275_v61 = vsub.f32 1.5, %v274_v59 }
  0x67   : > { %v285_v62 = vsub.f32 1.5, %v284_v60 }
  0x68   : > { %v276_v63 = vmul.f32 %v513_v53, %v275_v61 }
  0x69   : > { %v286_v0 = vmul.f32 %v515_v54, %v285_v62 }
  0x6a   : > { %v280_v1 = vsel %vm279_vm7, %v513_v53, %v276_v63 }
  0x6b   : > { %v290_v2 = vsel %vm289_vm6, %v515_v54, %v286_v0 }
  0x6c   : > { %v295_v3 = vrot.slane %v290_v2, 4 }
  0x6e   : > { %v296_v4 = vsel %vm216_vm0, %v280_v1, %v295_v3 }
  0x6f   : > { %v298_v5 = vmul.f32 %v296_v4, %v245_v31 }
  0x71   : > { %305 = vst [vmem:[#allocation1] ss:$2 sm:$0xff] %v298_v5 }
  0x78   : > { %v307_v7 = vld.sshfl [vmem:[#allocation1 + $0x8] sm:$0xff pattern:$0x75316420]  ;;  %v306_v8 = vld.sshfl [vmem:[#allocation1] sm:$0xff pattern:$0x75316420] }
  0x94   : > { %v302_v6 = vpop.permute.xlu0 %301 }
  0x95   : > { %v311_v9 = vmul.f32 %v307_v7, %v302_v6  ;;  %v310_v11 = vmul.f32 %v306_v8, %v302_v6 }
  0x9c   : > { %v315_v10 = vpop.permute.xlu0 %314 }
  0x9d   : > { %v318_v12 = vadd.f32 %v315_v10, %v311_v9  ;;  %v317_v13 = vadd.f32 %v315_v10, %v310_v11 }
  0x9f   : > { %v321_v14 = vrot.slane %v318_v12, 4 }
  0xa1   : > { %v322_v15 = vsel %vm216_vm0, %v317_v13, %v321_v14 }
  0xa2   : > { %324 = vst [vmem:[%s206_s6] sm:$0xff] %v322_v15 }
  0xa3   : > { %573 = shalt.err (!%p570_p13)
}
  0xa4   : > { %447 = dma.vmem_to_hbm [thread:$0]  (%p703_p9), %s342_s7, 128, %s344_s8, %s326_s15  }
  0xa5 PF: > { %s355_s11 = sand.u32 1, %s608_s12   ;;  %p454_p0 = pnand %p431_p12, %p710_p11 }
  0xa6   : > { %s356_s28 = scalar_lea.sflag [#allocation4], %s355_s11 }
  0xa7   : > { %p455_p1 = pneg %p454_p0 }
  0xa9   : > { %603 = dma.done.wait (%p455_p1), %s356_s28, 128  }
  0xaa   : > { %605 = vsyncadd (%p455_p1), %s356_s28, 4294967168  ;;  %s19_s17 = sadd.s32 1, %s628_s17   ;;  %s797_s12 = smov %s612_s13 }
  0xab   : > { %p16_p2 = scmp.ge.s32.totalorder %s19_s17, 4   ;;  %s798_s13 = smov %s616_s14 }
  0xac   : > { %s799_s14 = smov %s708_s26  ;;  %s800_s15 = smov %s624_s16 }
  0xad   : > { %s801_s16 = smov %s803_s20  ;;  %18 = sbr.rel (!%p16_p2) target bundleno = 6 (0x6), region = 77 }
  0xb2   :  { %362 = vsyncpa [#allocation3], 1 }
  0xb3   :  { %364 = vsyncpa [#allocation3 + $0x1], 1 }
  0xb4   :  { %365 = vsyncpa [#allocation4], 1 }
  0xb5   :  { %367 = vsyncpa [#allocation4 + $0x1], 1 }

</bundles_post_ra>
